<compile_context>
chip_gen: v6e
topology: v6e:2x2x1
jax: 0.10.0
libtpu: 0.0.40
codegen_flags: <defaults>
</compile_context>

<pallas_src>
import functools
import math

import jax
import jax.numpy as jnp
from jax.experimental import pallas as pl
from jax.experimental.pallas import tpu as pltpu


def _mha3d_kernel(feat_ref, q_ref, wkv_ref, bkv_ref, wo_ref, bo_ref, out_ref, *,
                  num_heads, head_dim, batch_tile, seq_len, scale):
    # feat_ref: (Bt*S, E)   Bt batch elements, rows flattened
    # q_ref   : (L, E)      projected queries (input independent)
    # wkv_ref : (E, 2E)     fused (key_layer -> in_proj_k | val_layer -> in_proj_v)
    # bkv_ref : (1, 2E)
    # wo_ref  : (E, E)      out_proj.weight^T
    # bo_ref  : (1, E)
    # out_ref : (Bt*L, E)
    H, D, Bt, S = num_heads, head_dim, batch_tile, seq_len
    E = H * D
    L = q_ref.shape[0]

    feat = feat_ref[...]                                                # (Bt*S, E)

    # One wide fused K/V projection on the MXU.
    kv = jnp.dot(feat, wkv_ref[...],
                 preferred_element_type=jnp.float32) + bkv_ref[...]     # (Bt*S, 2E)
    kv = kv.reshape(Bt, S, 2 * E)                                       # (Bt, S, 2E)

    # Queries are shared across the batch; broadcast once, slice per head.
    q_b = jnp.broadcast_to(q_ref[...], (Bt, L, E))                      # (Bt, L, E)

    o_heads = []
    for h in range(H):                       # static, H is small (== num_facts)
        lo, hi = h * D, (h + 1) * D
        q_h = q_b[:, :, lo:hi]                                          # (Bt, L, D)
        k_h = kv[:, :, lo:hi]                                           # (Bt, S, D)
        v_h = kv[:, :, E + lo:E + hi]                                   # (Bt, S, D)

        s = jnp.einsum('bld,bsd->bls', q_h, k_h,
                       preferred_element_type=jnp.float32) * scale      # (Bt, L, S)
        m = jnp.max(s, axis=-1, keepdims=True)
        p = jnp.exp(s - m)
        p = p / jnp.sum(p, axis=-1, keepdims=True)
        o_heads.append(jnp.einsum('bls,bsd->bld', p, v_h,
                                  preferred_element_type=jnp.float32))  # (Bt, L, D)

    # Standard MHA epilogue: concat heads, single output-projection matmul.
    o_cat = jnp.concatenate(o_heads, axis=-1)                           # (Bt, L, E)
    o_flat = o_cat.reshape(Bt * L, E)                                   # (Bt*L, E)
    out = jnp.dot(o_flat, wo_ref[...],
                  preferred_element_type=jnp.float32) + bo_ref[...]     # (Bt*L, E)
    out_ref[...] = out.astype(out_ref.dtype)


def mha3d_forward(feats, params, *, num_blocks=None):
    B, S, E = feats.shape
    query = params["query"]                 # (L, E), L == num_facts == num_heads
    L = query.shape[0]
    H = L
    assert E % H == 0, "num_feats must be divisible by num_facts"
    D = E // H
    scale = 1.0 / math.sqrt(D)

    w_key_lin = params["key_layer_w"]       # (E, E)
    w_val_lin = params["val_layer_w"]       # (E, E)
    in_proj_w = params["in_proj_weight"]    # (3E, E)
    in_proj_b = params["in_proj_bias"]      # (3E,)
    out_proj_w = params["out_proj_weight"]  # (E, E)
    out_proj_b = params["out_proj_bias"]    # (E,)

    wq, wk, wv = in_proj_w[:E], in_proj_w[E:2 * E], in_proj_w[2 * E:]
    bq, bk, bv = in_proj_b[:E], in_proj_b[E:2 * E], in_proj_b[2 * E:]

    # Q projection is input independent -> compute once in the glue.
    q = query @ wq.T + bq                                   # (L, E)

    # Fuse key/val Linear with MHA in-projection: K = feat @ (Wk_in @ WkLin)^T + bk.
    wk_fused = (wk @ w_key_lin).T                           # (E, E), cols = K feats
    wv_fused = (wv @ w_val_lin).T                           # (E, E), cols = V feats
    wkv = jnp.concatenate([wk_fused, wv_fused], axis=1)     # (E, 2E)
    bkv = jnp.concatenate([bk, bv]).reshape(1, 2 * E)       # (1, 2E)
    wo_t = out_proj_w.T                                     # (E, E)
    bo = out_proj_b.reshape(1, E)                           # (1, E)

    # Batch blocking: >=2 grid steps so both v7x TensorCores get work, but fall
    # back to a single step when the tiles would not be 8-sublane aligned.
    if num_blocks is None:
        num_blocks = 2 if B > 1 else 1
    while num_blocks > 1 and (((pl.cdiv(B, num_blocks) * L) % 8 != 0)
                              or ((pl.cdiv(B, num_blocks) * S) % 8 != 0)):
        num_blocks -= 1
    Bt = pl.cdiv(B, num_blocks)
    B_pad = Bt * num_blocks

    feats_flat = feats.reshape(B * S, E)
    if B_pad != B:
        pad = jnp.zeros(((B_pad - B) * S, E), feats.dtype)
        feats_flat = jnp.concatenate([feats_flat, pad], axis=0)

    kernel = functools.partial(_mha3d_kernel, num_heads=H, head_dim=D,
                               batch_tile=Bt, seq_len=S, scale=scale)

    flops = B_pad * (2 * S * E * (2 * E)          # fused K/V projection
                     + H * (4 * L * S * D)        # QK^T and PV
                     + 2 * L * E * E)             # output projection
    transcendentals = B_pad * H * L * S           # exp in softmax
    bytes_accessed = 4 * (B_pad * S * E + L * E + E * 2 * E + 2 * E
                          + E * E + E + B_pad * L * E)

    out_flat = pl.pallas_call(
        kernel,
        out_shape=jax.ShapeDtypeStruct((B_pad * L, E), feats.dtype),
        grid=(num_blocks,),
        in_specs=[
            pl.BlockSpec((Bt * S, E), lambda i: (i, 0)),     # feats rows
            pl.BlockSpec((L, E), lambda i: (0, 0)),          # projected queries
            pl.BlockSpec((E, 2 * E), lambda i: (0, 0)),      # fused K/V weights
            pl.BlockSpec((1, 2 * E), lambda i: (0, 0)),      # fused K/V bias
            pl.BlockSpec((E, E), lambda i: (0, 0)),          # out_proj weight^T
            pl.BlockSpec((1, E), lambda i: (0, 0)),          # out_proj bias
        ],
        out_specs=pl.BlockSpec((Bt * L, E), lambda i: (i, 0)),
        compiler_params=pltpu.CompilerParams(
            dimension_semantics=("parallel",)),
        cost_estimate=pl.CostEstimate(flops=flops,
                                      transcendentals=transcendentals,
                                      bytes_accessed=bytes_accessed),
    )(feats_flat, q, wkv, bkv, wo_t, bo)

    return out_flat.reshape(B_pad, L, E)[:B]


def mha3d_reference(feats, params):
    """Pure-JAX reference mirroring torch.nn.MultiheadAttention semantics."""
    B, S, E = feats.shape
    query = params["query"]
    L = query.shape[0]
    H = L
    D = E // H
    wq, wk, wv = (params["in_proj_weight"][:E],
                  params["in_proj_weight"][E:2 * E],
                  params["in_proj_weight"][2 * E:])
    bq, bk, bv = (params["in_proj_bias"][:E],
                  params["in_proj_bias"][E:2 * E],
                  params["in_proj_bias"][2 * E:])
    outs = []
    for b in range(B):
        feat = feats[b]
        k_in = feat @ params["key_layer_w"].T
        v_in = feat @ params["val_layer_w"].T
        q = query @ wq.T + bq
        k = k_in @ wk.T + bk
        v = v_in @ wv.T + bv
        qh = q.reshape(L, H, D).transpose(1, 0, 2)
        kh = k.reshape(S, H, D).transpose(1, 0, 2)
        vh = v.reshape(S, H, D).transpose(1, 0, 2)
        scores = jnp.einsum('hld,hsd->hls', qh, kh) / math.sqrt(D)
        p = jax.nn.softmax(scores, axis=-1)
        oh = jnp.einsum('hls,hsd->hld', p, vh)
        o = oh.transpose(1, 0, 2).reshape(L, E)
        outs.append(o @ params["out_proj_weight"].T + params["out_proj_bias"])
    return jnp.stack(outs)


if __name__ == "__main__":
    num_facts = 4     # == number of attention heads
    num_feats = 32    # embedding dim, divisible by num_facts
    batch, seq = 8, 8

    key = jax.random.PRNGKey(0)
    ks = jax.random.split(key, 8)
    params = {
        "query": jax.random.uniform(ks[0], (num_facts, num_feats), jnp.float32),
        "key_layer_w": 0.1 * jax.random.normal(ks[1], (num_feats, num_feats), jnp.float32),
        "val_layer_w": 0.1 * jax.random.normal(ks[2], (num_feats, num_feats), jnp.float32),
        "in_proj_weight": 0.1 * jax.random.normal(ks[3], (3 * num_feats, num_feats), jnp.float32),
        "in_proj_bias": 0.1 * jax.random.normal(ks[4], (3 * num_feats,), jnp.float32),
        "out_proj_weight": 0.1 * jax.random.normal(ks[5], (num_feats, num_feats), jnp.float32),
        "out_proj_bias": 0.1 * jax.random.normal(ks[6], (num_feats,), jnp.float32),
    }
    feats = jax.random.normal(ks[7], (batch, seq, num_feats), jnp.float32)

    out = jax.block_until_ready(mha3d_forward(feats, params))
    ref = mha3d_reference(feats, params)

    assert out.shape == (batch, num_facts, num_feats), out.shape
    err = float(jnp.max(jnp.abs(out - ref)))
    assert jnp.allclose(out, ref, atol=2e-5, rtol=1e-5), err
    print("KERNEL_OK")
</pallas_src>

<mosaic_0001>
module attributes {stable_mosaic.version = 11 : i64} {
  func.func @_mha3d_kernel(%arg0: i32, %arg1: memref<32x32xf32, #tpu.memory_space<vmem>>, %arg2: memref<4x32xf32, #tpu.memory_space<vmem>>, %arg3: memref<32x64xf32, #tpu.memory_space<vmem>>, %arg4: memref<1x64xf32, #tpu.memory_space<vmem>>, %arg5: memref<32x32xf32, #tpu.memory_space<vmem>>, %arg6: memref<1x32xf32, #tpu.memory_space<vmem>>, %arg7: memref<16x32xf32, #tpu.memory_space<vmem>>) attributes {dimension_semantics = [#tpu.dimension_semantics<parallel>], iteration_bounds = array<i64: 2>, scalar_prefetch = 0 : i64, scratch_operands = 0 : i64, tpu.core_type = #tpu.core_type<tc>, window_params = [{transform_indices = @transform_0, window_bounds = array<i64: 32, 32>}, {pipeline_mode = #tpu.pipeline_mode<synchronous>, transform_indices = @transform_1, window_bounds = array<i64: 4, 32>}, {pipeline_mode = #tpu.pipeline_mode<synchronous>, transform_indices = @transform_2, window_bounds = array<i64: 32, 64>}, {pipeline_mode = #tpu.pipeline_mode<synchronous>, transform_indices = @transform_3, window_bounds = array<i64: 1, 64>}, {pipeline_mode = #tpu.pipeline_mode<synchronous>, transform_indices = @transform_4, window_bounds = array<i64: 32, 32>}, {pipeline_mode = #tpu.pipeline_mode<synchronous>, transform_indices = @transform_5, window_bounds = array<i64: 1, 32>}, {transform_indices = @transform_6, window_bounds = array<i64: 16, 32>}]} {
    %c0 = arith.constant 0 : index
    %c0_0 = arith.constant 0 : index
    %0 = vector.load %arg1[%c0, %c0_0] : memref<32x32xf32, #tpu.memory_space<vmem>>, vector<32x32xf32>
    %c0_1 = arith.constant 0 : index
    %c0_2 = arith.constant 0 : index
    %1 = vector.load %arg3[%c0_1, %c0_2] : memref<32x64xf32, #tpu.memory_space<vmem>>, vector<32x64xf32>
    %cst = arith.constant dense<0.000000e+00> : vector<32x64xf32>
    %2 = tpu.matmul %0, %1, %cst {dimension_numbers = #tpu.dot_dimension_numbers<[1], [0], [0], [1], [0, 0, 1, 1], [], []>} : vector<32x32xf32>, vector<32x64xf32>, vector<32x64xf32> -> vector<32x64xf32>
    %c0_3 = arith.constant 0 : index
    %c0_4 = arith.constant 0 : index
    %3 = vector.load %arg4[%c0_3, %c0_4] : memref<1x64xf32, #tpu.memory_space<vmem>>, vector<1x64xf32>
    %4 = vector.broadcast %3 : vector<1x64xf32> to vector<32x64xf32>
    %5 = arith.addf %2, %4 : vector<32x64xf32>
    %6 = vector.shape_cast %5 : vector<32x64xf32> to vector<4x8x64xf32>
    %c0_5 = arith.constant 0 : index
    %c0_6 = arith.constant 0 : index
    %7 = vector.load %arg2[%c0_5, %c0_6] : memref<4x32xf32, #tpu.memory_space<vmem>>, vector<4x32xf32>
    %8 = vector.shape_cast %7 : vector<4x32xf32> to vector<1x4x32xf32>
    %9 = vector.broadcast %8 : vector<1x4x32xf32> to vector<4x4x32xf32>
    %10 = vector.extract_strided_slice %9 {offsets = [0, 0, 0], sizes = [4, 4, 8], strides = [1, 1, 1]} : vector<4x4x32xf32> to vector<4x4x8xf32>
    %11 = vector.extract_strided_slice %6 {offsets = [0, 0, 0], sizes = [4, 8, 8], strides = [1, 1, 1]} : vector<4x8x64xf32> to vector<4x8x8xf32>
    %12 = vector.extract_strided_slice %6 {offsets = [0, 0, 32], sizes = [4, 8, 8], strides = [1, 1, 1]} : vector<4x8x64xf32> to vector<4x8x8xf32>
    "tpu.trace_start"() <{level = 10 : i32, message = "bld,bsd->bls"}> : () -> ()
    %cst_7 = arith.constant dense<0.000000e+00> : vector<4x4x8xf32>
    %13 = tpu.matmul %10, %11, %cst_7 {dimension_numbers = #tpu.dot_dimension_numbers<[2], [2], [1], [1], [0, 0, 0, 1, 1, 1], [0], [0]>} : vector<4x4x8xf32>, vector<4x8x8xf32>, vector<4x4x8xf32> -> vector<4x4x8xf32>
    "tpu.trace_stop"() : () -> ()
    %cst_8 = arith.constant 0.353553385 : f32
    %14 = vector.broadcast %cst_8 : f32 to vector<4x4x8xf32>
    %15 = arith.mulf %13, %14 : vector<4x4x8xf32>
    %cst_9 = arith.constant dense<0xFF800000> : vector<4x4xf32>
    %16 = vector.multi_reduction <maximumf>, %15, %cst_9 [2] : vector<4x4x8xf32> to vector<4x4xf32>
    %17 = vector.shape_cast %16 : vector<4x4xf32> to vector<4x4x1xf32>
    %18 = vector.broadcast %17 : vector<4x4x1xf32> to vector<4x4x8xf32>
    %19 = arith.subf %15, %18 : vector<4x4x8xf32>
    %20 = math.exp %19 : vector<4x4x8xf32>
    %cst_10 = arith.constant dense<0.000000e+00> : vector<4x4xf32>
    %21 = vector.multi_reduction <add>, %20, %cst_10 [2] : vector<4x4x8xf32> to vector<4x4xf32>
    %22 = vector.shape_cast %21 : vector<4x4xf32> to vector<4x4x1xf32>
    %23 = vector.broadcast %22 : vector<4x4x1xf32> to vector<4x4x8xf32>
    %24 = arith.divf %20, %23 : vector<4x4x8xf32>
    "tpu.trace_start"() <{level = 10 : i32, message = "bls,bsd->bld"}> : () -> ()
    %cst_11 = arith.constant dense<0.000000e+00> : vector<4x4x8xf32>
    %25 = tpu.matmul %24, %12, %cst_11 {dimension_numbers = #tpu.dot_dimension_numbers<[2], [1], [1], [2], [0, 0, 0, 1, 1, 2], [0], [0]>} : vector<4x4x8xf32>, vector<4x8x8xf32>, vector<4x4x8xf32> -> vector<4x4x8xf32>
    "tpu.trace_stop"() : () -> ()
    %26 = vector.extract_strided_slice %9 {offsets = [0, 0, 8], sizes = [4, 4, 8], strides = [1, 1, 1]} : vector<4x4x32xf32> to vector<4x4x8xf32>
    %27 = vector.extract_strided_slice %6 {offsets = [0, 0, 8], sizes = [4, 8, 8], strides = [1, 1, 1]} : vector<4x8x64xf32> to vector<4x8x8xf32>
    %28 = vector.extract_strided_slice %6 {offsets = [0, 0, 40], sizes = [4, 8, 8], strides = [1, 1, 1]} : vector<4x8x64xf32> to vector<4x8x8xf32>
    "tpu.trace_start"() <{level = 10 : i32, message = "bld,bsd->bls"}> : () -> ()
    %cst_12 = arith.constant dense<0.000000e+00> : vector<4x4x8xf32>
    %29 = tpu.matmul %26, %27, %cst_12 {dimension_numbers = #tpu.dot_dimension_numbers<[2], [2], [1], [1], [0, 0, 0, 1, 1, 1], [0], [0]>} : vector<4x4x8xf32>, vector<4x8x8xf32>, vector<4x4x8xf32> -> vector<4x4x8xf32>
    "tpu.trace_stop"() : () -> ()
    %cst_13 = arith.constant 0.353553385 : f32
    %30 = vector.broadcast %cst_13 : f32 to vector<4x4x8xf32>
    %31 = arith.mulf %29, %30 : vector<4x4x8xf32>
    %cst_14 = arith.constant dense<0xFF800000> : vector<4x4xf32>
    %32 = vector.multi_reduction <maximumf>, %31, %cst_14 [2] : vector<4x4x8xf32> to vector<4x4xf32>
    %33 = vector.shape_cast %32 : vector<4x4xf32> to vector<4x4x1xf32>
    %34 = vector.broadcast %33 : vector<4x4x1xf32> to vector<4x4x8xf32>
    %35 = arith.subf %31, %34 : vector<4x4x8xf32>
    %36 = math.exp %35 : vector<4x4x8xf32>
    %cst_15 = arith.constant dense<0.000000e+00> : vector<4x4xf32>
    %37 = vector.multi_reduction <add>, %36, %cst_15 [2] : vector<4x4x8xf32> to vector<4x4xf32>
    %38 = vector.shape_cast %37 : vector<4x4xf32> to vector<4x4x1xf32>
    %39 = vector.broadcast %38 : vector<4x4x1xf32> to vector<4x4x8xf32>
    %40 = arith.divf %36, %39 : vector<4x4x8xf32>
    "tpu.trace_start"() <{level = 10 : i32, message = "bls,bsd->bld"}> : () -> ()
    %cst_16 = arith.constant dense<0.000000e+00> : vector<4x4x8xf32>
    %41 = tpu.matmul %40, %28, %cst_16 {dimension_numbers = #tpu.dot_dimension_numbers<[2], [1], [1], [2], [0, 0, 0, 1, 1, 2], [0], [0]>} : vector<4x4x8xf32>, vector<4x8x8xf32>, vector<4x4x8xf32> -> vector<4x4x8xf32>
    "tpu.trace_stop"() : () -> ()
    %42 = vector.extract_strided_slice %9 {offsets = [0, 0, 16], sizes = [4, 4, 8], strides = [1, 1, 1]} : vector<4x4x32xf32> to vector<4x4x8xf32>
    %43 = vector.extract_strided_slice %6 {offsets = [0, 0, 16], sizes = [4, 8, 8], strides = [1, 1, 1]} : vector<4x8x64xf32> to vector<4x8x8xf32>
    %44 = vector.extract_strided_slice %6 {offsets = [0, 0, 48], sizes = [4, 8, 8], strides = [1, 1, 1]} : vector<4x8x64xf32> to vector<4x8x8xf32>
    "tpu.trace_start"() <{level = 10 : i32, message = "bld,bsd->bls"}> : () -> ()
    %cst_17 = arith.constant dense<0.000000e+00> : vector<4x4x8xf32>
    %45 = tpu.matmul %42, %43, %cst_17 {dimension_numbers = #tpu.dot_dimension_numbers<[2], [2], [1], [1], [0, 0, 0, 1, 1, 1], [0], [0]>} : vector<4x4x8xf32>, vector<4x8x8xf32>, vector<4x4x8xf32> -> vector<4x4x8xf32>
    "tpu.trace_stop"() : () -> ()
    %cst_18 = arith.constant 0.353553385 : f32
    %46 = vector.broadcast %cst_18 : f32 to vector<4x4x8xf32>
    %47 = arith.mulf %45, %46 : vector<4x4x8xf32>
    %cst_19 = arith.constant dense<0xFF800000> : vector<4x4xf32>
    %48 = vector.multi_reduction <maximumf>, %47, %cst_19 [2] : vector<4x4x8xf32> to vector<4x4xf32>
    %49 = vector.shape_cast %48 : vector<4x4xf32> to vector<4x4x1xf32>
    %50 = vector.broadcast %49 : vector<4x4x1xf32> to vector<4x4x8xf32>
    %51 = arith.subf %47, %50 : vector<4x4x8xf32>
    %52 = math.exp %51 : vector<4x4x8xf32>
    %cst_20 = arith.constant dense<0.000000e+00> : vector<4x4xf32>
    %53 = vector.multi_reduction <add>, %52, %cst_20 [2] : vector<4x4x8xf32> to vector<4x4xf32>
    %54 = vector.shape_cast %53 : vector<4x4xf32> to vector<4x4x1xf32>
    %55 = vector.broadcast %54 : vector<4x4x1xf32> to vector<4x4x8xf32>
    %56 = arith.divf %52, %55 : vector<4x4x8xf32>
    "tpu.trace_start"() <{level = 10 : i32, message = "bls,bsd->bld"}> : () -> ()
    %cst_21 = arith.constant dense<0.000000e+00> : vector<4x4x8xf32>
    %57 = tpu.matmul %56, %44, %cst_21 {dimension_numbers = #tpu.dot_dimension_numbers<[2], [1], [1], [2], [0, 0, 0, 1, 1, 2], [0], [0]>} : vector<4x4x8xf32>, vector<4x8x8xf32>, vector<4x4x8xf32> -> vector<4x4x8xf32>
    "tpu.trace_stop"() : () -> ()
    %58 = vector.extract_strided_slice %9 {offsets = [0, 0, 24], sizes = [4, 4, 8], strides = [1, 1, 1]} : vector<4x4x32xf32> to vector<4x4x8xf32>
    %59 = vector.extract_strided_slice %6 {offsets = [0, 0, 24], sizes = [4, 8, 8], strides = [1, 1, 1]} : vector<4x8x64xf32> to vector<4x8x8xf32>
    %60 = vector.extract_strided_slice %6 {offsets = [0, 0, 56], sizes = [4, 8, 8], strides = [1, 1, 1]} : vector<4x8x64xf32> to vector<4x8x8xf32>
    "tpu.trace_start"() <{level = 10 : i32, message = "bld,bsd->bls"}> : () -> ()
    %cst_22 = arith.constant dense<0.000000e+00> : vector<4x4x8xf32>
    %61 = tpu.matmul %58, %59, %cst_22 {dimension_numbers = #tpu.dot_dimension_numbers<[2], [2], [1], [1], [0, 0, 0, 1, 1, 1], [0], [0]>} : vector<4x4x8xf32>, vector<4x8x8xf32>, vector<4x4x8xf32> -> vector<4x4x8xf32>
    "tpu.trace_stop"() : () -> ()
    %cst_23 = arith.constant 0.353553385 : f32
    %62 = vector.broadcast %cst_23 : f32 to vector<4x4x8xf32>
    %63 = arith.mulf %61, %62 : vector<4x4x8xf32>
    %cst_24 = arith.constant dense<0xFF800000> : vector<4x4xf32>
    %64 = vector.multi_reduction <maximumf>, %63, %cst_24 [2] : vector<4x4x8xf32> to vector<4x4xf32>
    %65 = vector.shape_cast %64 : vector<4x4xf32> to vector<4x4x1xf32>
    %66 = vector.broadcast %65 : vector<4x4x1xf32> to vector<4x4x8xf32>
    %67 = arith.subf %63, %66 : vector<4x4x8xf32>
    %68 = math.exp %67 : vector<4x4x8xf32>
    %cst_25 = arith.constant dense<0.000000e+00> : vector<4x4xf32>
    %69 = vector.multi_reduction <add>, %68, %cst_25 [2] : vector<4x4x8xf32> to vector<4x4xf32>
    %70 = vector.shape_cast %69 : vector<4x4xf32> to vector<4x4x1xf32>
    %71 = vector.broadcast %70 : vector<4x4x1xf32> to vector<4x4x8xf32>
    %72 = arith.divf %68, %71 : vector<4x4x8xf32>
    "tpu.trace_start"() <{level = 10 : i32, message = "bls,bsd->bld"}> : () -> ()
    %cst_26 = arith.constant dense<0.000000e+00> : vector<4x4x8xf32>
    %73 = tpu.matmul %72, %60, %cst_26 {dimension_numbers = #tpu.dot_dimension_numbers<[2], [1], [1], [2], [0, 0, 0, 1, 1, 2], [0], [0]>} : vector<4x4x8xf32>, vector<4x8x8xf32>, vector<4x4x8xf32> -> vector<4x4x8xf32>
    "tpu.trace_stop"() : () -> ()
    %74 = tpu.concatenate %25, %41, %57, %73 in 2 : vector<4x4x8xf32>, vector<4x4x8xf32>, vector<4x4x8xf32>, vector<4x4x8xf32> -> vector<4x4x32xf32>
    %75 = vector.shape_cast %74 : vector<4x4x32xf32> to vector<16x32xf32>
    %c0_27 = arith.constant 0 : index
    %c0_28 = arith.constant 0 : index
    %76 = vector.load %arg5[%c0_27, %c0_28] : memref<32x32xf32, #tpu.memory_space<vmem>>, vector<32x32xf32>
    %cst_29 = arith.constant dense<0.000000e+00> : vector<16x32xf32>
    %77 = tpu.matmul %75, %76, %cst_29 {dimension_numbers = #tpu.dot_dimension_numbers<[1], [0], [0], [1], [0, 0, 1, 1], [], []>} : vector<16x32xf32>, vector<32x32xf32>, vector<16x32xf32> -> vector<16x32xf32>
    %c0_30 = arith.constant 0 : index
    %c0_31 = arith.constant 0 : index
    %78 = vector.load %arg6[%c0_30, %c0_31] : memref<1x32xf32, #tpu.memory_space<vmem>>, vector<1x32xf32>
    %79 = vector.broadcast %78 : vector<1x32xf32> to vector<16x32xf32>
    %80 = arith.addf %77, %79 : vector<16x32xf32>
    %c0_32 = arith.constant 0 : index
    %c0_33 = arith.constant 0 : index
    %81 = vector.load %arg7[%c0_32, %c0_33] : memref<16x32xf32, #tpu.memory_space<vmem>>, vector<16x32xf32>
    tpu.vector_store %arg7[%c0_32, %c0_33], %80 {strides = array<i32>} : memref<16x32xf32, #tpu.memory_space<vmem>>, vector<16x32xf32>,
    return
  }
  func.func @transform_0(%arg0: i32) -> (i32, i32) {
    %c0_i32 = arith.constant 0 : i32
    %c0_i32_0 = arith.constant 0 : i32
    return %arg0, %c0_i32 : i32, i32
  }
  func.func @transform_1(%arg0: i32) -> (i32, i32) {
    %c0_i32 = arith.constant 0 : i32
    %c0_i32_0 = arith.constant 0 : i32
    %c0_i32_1 = arith.constant 0 : i32
    return %c0_i32, %c0_i32_0 : i32, i32
  }
  func.func @transform_2(%arg0: i32) -> (i32, i32) {
    %c0_i32 = arith.constant 0 : i32
    %c0_i32_0 = arith.constant 0 : i32
    %c0_i32_1 = arith.constant 0 : i32
    return %c0_i32, %c0_i32_0 : i32, i32
  }
  func.func @transform_3(%arg0: i32) -> (i32, i32) {
    %c0_i32 = arith.constant 0 : i32
    %c0_i32_0 = arith.constant 0 : i32
    %c0_i32_1 = arith.constant 0 : i32
    return %c0_i32, %c0_i32_0 : i32, i32
  }
  func.func @transform_4(%arg0: i32) -> (i32, i32) {
    %c0_i32 = arith.constant 0 : i32
    %c0_i32_0 = arith.constant 0 : i32
    %c0_i32_1 = arith.constant 0 : i32
    return %c0_i32, %c0_i32_0 : i32, i32
  }
  func.func @transform_5(%arg0: i32) -> (i32, i32) {
    %c0_i32 = arith.constant 0 : i32
    %c0_i32_0 = arith.constant 0 : i32
    %c0_i32_1 = arith.constant 0 : i32
    return %c0_i32, %c0_i32_0 : i32, i32
  }
  func.func @transform_6(%arg0: i32) -> (i32, i32) {
    %c0_i32 = arith.constant 0 : i32
    %c0_i32_0 = arith.constant 0 : i32
    return %arg0, %c0_i32 : i32, i32
  }
}

</mosaic_0001>

<bundles_post_ra>
// kernel: tpu_custom_call.1
= control target key start
LH: loop header
LB: loop body
LE: loop exit
PB: predicated region body
PF: predicated region fallthrough
CT: control target
= control target key end

     0   :  { %11 = vsyncpa [#allocation3], 0  ;;  %s4206_s0 = inlined_call_operand.vmem [shape: f32[64,32], index: 0, kind: input, shape index: {}]   ;;  %s4207_s1 = inlined_call_operand.vmem [shape: f32[4,32], index: 1, kind: input, shape index: {}]   ;;  %s4208_s2 = inlined_call_operand.vmem [shape: f32[32,64], index: 2, kind: input, shape index: {}]   ;;  %s4209_s3 = inlined_call_operand.vmem [shape: f32[1,64], index: 3, kind: input, shape index: {}]   ;;  %s4210_s4 = inlined_call_operand.vmem [shape: f32[32,32], index: 4, kind: input, shape index: {}]   ;;  %s4211_s5 = inlined_call_operand.vmem [shape: f32[1,32], index: 5, kind: input, shape index: {}]   ;;  %s4212_s6 = inlined_call_operand.hbm [shape: f32[32,32], index: 6, kind: output, shape index: {}]  }
   0x1   :  { %13 = vsyncpa [#allocation3 + $0x1], 0  ;;  %s3767_s21 = smov 0   ;;  %s3769_s22 = smov 0  }
   0x2   :  { %s3771_s23 = smov 0   ;;  %s3773_s24 = smov 0  }
   0x3 LB: > { %s3788_s25 = sadd.s32 4294967295, %s3716_s24   ;;  %s3208_s26 = sadd.s32 4294967294, %s3716_s24   ;;  %s3716_s24 = sphi %s3773_s24, %s4218_s24   ;;  %s3712_s23 = sphi %s3771_s23, %s4217_s23   ;;  %s3708_s22 = sphi %s3769_s22, %s4216_s22   ;;  %s3704_s21 = sphi %s3767_s21, %s4215_s21  }
   0x4   : > { %s3792_s27 = sadd.s32 1, %s3716_s24   ;;  %s157_s28 = sadd.s32 1, %s3712_s23 }
   0x5   : > { %s154_s29 = ssub.s32 %s3716_s24, %s3792_s27  ;;  %p167_p0 = scmp.ne.s32.totalorder %s3712_s23, %s3708_s22 }
   0x6   : > { %p155_p1 = scmp.eq.s32.totalorder %s154_s29, 0  ;;  %p168_p2 = scmp.eq.s32.totalorder %s3788_s25, 1 }
   0x7   : > { %p173_p3 = scmp.ne.s32.totalorder %s3708_s22, %s3704_s21  ;;  %p174_p4 = scmp.eq.s32.totalorder %s3208_s26, 1 }
   0x8   : > { %s3803_s30 = scalar_select %p155_p1, %s3712_s23, %s157_s28  }
   0x9   : > { %p3805_p5 = por %p168_p2, %p167_p0  ;;  %p3809_p6 = por %p174_p4, %p173_p3 }
   0xa   : > { %p3211_p7 = scmp.ge.s32.totalorder %s3716_s24, 1  ;;  %p216_p8 = scmp.lt.s32.totalorder %s3716_s24, 3 }
   0xc   : > { %p217_p9 = pnand %p3211_p7, %p216_p8 }
   0xd   : > { %s3213_s13 = sshll.u32 (!%p217_p9), %s3788_s25, 2  ;;  %s3720_s11 = smov (!%p217_p9), 96  }
   0xe   : > { %220 = sbr.rel (%p217_p9) target bundleno = 2830 (0xb0e), region = 44  ;;  %p247_p10 = scmp.lt.s32.totalorder (!%p217_p9), %s3213_s13, 7 }
   0xf   : > { %s3721_s12 = smov (!%p217_p9), 120   ;;  %s3723_s14 = smov (!%p217_p9), 112  }
  0x10   : > { %s3724_s15 = smov (!%p217_p9), 80   ;;  %s3725_s16 = smov (!%p217_p9), 104  }
  0x11   : > { %s3726_s17 = smov (!%p217_p9), 72   ;;  %s3728_s19 = smov (!%p217_p9), 16  }
  0x13   : > { %v260_v0 = vld [vmem:[%s4208_s2 + $0x18] sm:$0xff]  ;;  %v259_v1 = vld [vmem:[%s4208_s2 + $0x10] sm:$0xff]  ;;  %v258_v2 = vld [vmem:[%s4208_s2 + $0x8] sm:$0xff]  ;;  %s4220_s13 = smov (!%p247_p10, %s3213_s13), 7  ;;  %vm268_vm0 = vcmask 261120   ;;  %v3718_v8 = vmov 0.0  }
  0x14   : > { %3355 = vmatprep.subr.mxu0 %v260_v0  ;;  %v257_v3 = vld [vmem:[%s4208_s2] sm:$0xff]  ;;  %s3214_s18 = sshll.u32 %s4220_s13, 3  ;;  %3369 = vmatprep.subr.mxu1 %v3718_v8  ;;  %vm3719_vm1 = vmmov 0   ;;  %vm367_vm2 = vcmask 64512   ;;  %vm667_vm3 = vcmask 60416   ;;  %s3722_s13 = smov 88  }
  0x15   : > { %3356 = vmatpush3.msra.mxu0 %v260_v0  ;;  %s250_s26 = scalar_lea.vmem %s4206_s0, %s3214_s18  ;;  %3371 = vmatprep.mubr.msk.f32.mxu1 %vm3719_vm1, %v3718_v8  ;;  %v3215_v10 = vld [vmem:[%s4209_s3] ss:$0 sm:$0xff]  ;;  %s3727_s18 = smov 8   ;;  %vm3024_vm4 = vcmask 130048   ;;  %vm3029_vm5 = vcmask 195584  }
  0x16   : > { %3357 = vmatprep.subr.mxu0 %v259_v1  ;;  %v253_v4 = vld [vmem:[%s250_s26] sm:$0xff]  ;;  %v254_v5 = vld [vmem:[%s250_s26 + $0x8] sm:$0xff]  ;;  %v255_v6 = vld [vmem:[%s250_s26 + $0x10] sm:$0xff] }
  0x17   : > { %3358 = vmatpush3.msra.mxu0 %v259_v1  ;;  %3363 = vmatprep.mubr.msk.f32.mxu0 %vm268_vm0, %v253_v4  ;;  %v256_v7 = vld [vmem:[%s250_s26 + $0x18] sm:$0xff]  ;;  %v3853_v15 = vld [vmem:[%s4207_s1] sm:$0xf]  ;;  %s3276_s26 = sshll.u32 %s3788_s25, 8 }
  0x18   : > { %3359 = vmatprep.subr.mxu0 %v258_v2  ;;  %s4162_s9 = scalar_lea.hbm %s4212_s6, %s3276_s26 }
  0x19   : > { %3360 = vmatpush3.msra.mxu0 %v258_v2 }
  0x1a   : > { %3361 = vmatprep.subr.mxu0 %v257_v3 }
  0x1b   : > { %3362 = vmatpush3.msra.mxu0 %v257_v3 }
  0x1c   : > { %3364 = vmatmul.mubr.msk.f32.vlgmr.msra.gmra.mxu0 %vm268_vm0, %v254_v5  ;;  %3384 = vmatprep.subr.mxu0 %v3718_v8 }
  0x1d   : > { %3366 = vmatprep.mubr.msk.f32.mxu0 %vm268_vm0, %v255_v6 }
  0x20   : > { %3367 = vmatmul.mubr.msk.f32.gmra.mxu0 %vm268_vm0, %v256_v7 }
  0x21   : > { %3386 = vmatprep.mubr.msk.f32.mxu0 %vm3719_vm1, %v3718_v8 }
  0xdc   : > { %v3365_v9 = vpop.f32.mrf.mxu0 }
  0xdd   : > { %v3856_v16 = vadd.f32 %v3365_v9, %v3215_v10 }
  0xde   : > { %v347_v11 = vpop.f32.mrf.mxu0 }
  0xdf   : > { %v3844_v12 = vadd.f32 %v3215_v10, %v347_v11 }
  0xe0   : > { %v3368_v13 = vpop.f32.mrf.mxu0 }
  0xe1   : > { %3370 = vmatpush3.xpose.msk.msra.mxu1 %vm367_vm2, %v3844_v12  ;;  %v3848_v14 = vadd.f32 %v3368_v13, %v3215_v10 }
  0xe2   : > { %3374 = vmatprep.subr.mxu1 %v3718_v8  ;;  %v357_v17 = vpop.f32.mrf.mxu0 }
  0xe3   : > { %3385 = vmatpush3.xpose.msk.msra.mxu0 %vm367_vm2, %v3848_v14  ;;  %v3870_v18 = vadd.f32 %v3215_v10, %v357_v17 }
  0xe4   : > { %3372 = vmatmul.mubr.msk.f32.vlgmr.msra.gmra.mxu1 %vm367_vm2, %v3853_v15  ;;  %3394 = vmatprep.subr.mxu0 %v3718_v8 }
  0xe5   : > { %3375 = vmatpush3.xpose.msk.msra.mxu1 %vm367_vm2, %v3856_v16  ;;  %3376 = vmatprep.mubr.msk.f32.mxu1 %vm3719_vm1, %v3718_v8 }
  0xe6   : > { %3379 = vmatprep.subr.mxu1 %v3718_v8  ;;  %3387 = vmatmul.mubr.msk.f32.vlgmr.msra.gmra.mxu0 %vm367_vm2, %v3853_v15 }
  0xe7   : > { %3396 = vmatprep.mubr.msk.f32.mxu0 %vm3719_vm1, %v3718_v8 }
  0xe8   : > { %3377 = vmatmul.mubr.msk.f32.vlgmr.msra.gmra.mxu1 %vm367_vm2, %v3853_v15 }
  0xe9   : > { %3380 = vmatpush3.xpose.msk.msra.mxu1 %vm367_vm2, %v3870_v18  ;;  %3381 = vmatprep.mubr.msk.f32.mxu1 %vm3719_vm1, %v3718_v8 }
  0xea   : > { %3389 = vmatprep.subr.mxu1 %v3718_v8 }
  0xec   : > { %3382 = vmatmul.mubr.msk.f32.vlgmr.msra.gmra.mxu1 %vm367_vm2, %v3853_v15 }
  0xed   : > { %3391 = vmatprep.mubr.msk.f32.mxu1 %vm3719_vm1, %v3718_v8 }
 0x1a4   : > { %v440_v19 = vpop.f32.mrf.mxu1 }
 0x1a5   : > { %v663_v20 = vmul.f32 0.35355338, %v440_v19 }
 0x1a6   : > { %v3373_v21 = vpop.f32.mrf.mxu1  ;;  %v659_v22 = vpop.f32.mrf.mxu0 }
 0x1a7   : > { %v668_v23 = vsel %vm667_vm3, %v663_v20, -inf  ;;  %v666_v31 = vmul.f32 0.35355338, %v659_v22 }
 0x1a8   : > { %669 = vmax.xlane.f32.xlu0 %v668_v23  ;;  %v513_v24 = vpop.f32.mrf.mxu1  ;;  %v3388_v25 = vpop.f32.mrf.mxu0 }
 0x1a9   : > { %v664_v26 = vmul.f32 0.35355338, %v513_v24  ;;  %v677_v34 = vsel %vm667_vm3, %v666_v31, -inf }
 0x1aa   : > { %v3378_v27 = vpop.f32.mrf.mxu1 }
 0x1ab   : > { %v671_v28 = vsel %vm667_vm3, %v664_v26, -inf }
 0x1ac   : > { %672 = vmax.xlane.f32.xlu0 %v671_v28  ;;  %v586_v29 = vpop.f32.mrf.mxu1 }
 0x1ad   : > { %v665_v30 = vmul.f32 0.35355338, %v586_v29 }
 0x1ae   : > { %v3383_v32 = vpop.f32.mrf.mxu1 }
 0x1af   : > { %v674_v33 = vsel %vm667_vm3, %v665_v30, -inf }
 0x1b0   : > { %675 = vmax.xlane.f32.xlu1 %v674_v33 }
 0x1b4   : > { %678 = vmax.xlane.f32.xlu1 %v677_v34 }
 0x1c2   : > { %712 = vrot.lane.b32.xlu0 %v3844_v12, %s3720_s11 }
 0x1c5   : > { %788 = vrot.lane.b32.xlu1 %v3856_v16, %s3720_s11 }
 0x1c6   : > { %1018 = vrot.lane.b32.xlu0 %v3844_v12, %s3721_s12 }
 0x1c9   : > { %864 = vrot.lane.b32.xlu1 %v3870_v18, %s3720_s11 }
 0x1cd   : > { %940 = vrot.lane.b32.xlu1 %v3848_v14, %s3720_s11  ;;  %s3730_s11 = smov [#allocation2]  }
 0x231   : > { %v670_v35 = vpop.xlane.xlu0 %669 }
 0x232   : > { %v680_v36 = vsub.f32 %v663_v20, %v670_v35 }
 0x234   : > { %v684_v37 = vmul.f32 1.442695, %v680_v36 }
 0x235   : > { %v673_v38 = vpop.xlane.xlu0 %672 }
 0x236   : > { %3592 = vpow2.f32 %v684_v37  ;;  %v681_v42 = vsub.f32 %v664_v26, %v673_v38 }
 0x238   : > { %v686_v46 = vmul.f32 1.442695, %v681_v42 }
 0x239   : > { %v713_v39 = vpop.permute.xlu0 %712  ;;  %v676_v40 = vpop.xlane.xlu1 %675 }
 0x23a   : > { %v682_v41 = vsub.f32 %v665_v30, %v676_v40  ;;  %3390 = vmatpush3.msra.mxu1 %v713_v39 }
 0x23b   : > { %3399 = vmatprep.subr.mxu1 %v3718_v8 }
 0x23c   : > { %v688_v43 = vmul.f32 1.442695, %v682_v41 }
 0x23d   : > { %v679_v44 = vpop.xlane.xlu1 %678  ;;  %v1019_v57 = vpop.permute.xlu0 %1018 }
 0x23e   : > { %3594 = vpow2.f32 %v688_v43  ;;  %v683_v45 = vsub.f32 %v666_v31, %v679_v44 }
 0x240   : > { %v690_v47 = vmul.f32 1.442695, %v683_v45 }
 0x241   : > { %v789_v48 = vpop.permute.xlu1 %788 }
 0x242   : > { %3596 = vpow2.f32 %v690_v47  ;;  %3395 = vmatpush3.msra.mxu0 %v789_v48 }
 0x243   : > { %v3593_v49 = vpop.eup %3592  ;;  %3404 = vmatprep.subr.mxu0 %v3718_v8  ;;  %3598 = vpow2.f32 %v686_v46 }
 0x244   : > { %v692_v50 = vsel %vm667_vm3, %v3593_v49, 0.0 }
 0x245   : > { %693 = vadd.xlane.f32.xlu0 %v692_v50  ;;  %v865_v59 = vpop.permute.xlu1 %864 }
 0x249   : > { %v941_v60 = vpop.permute.xlu1 %940 }
 0x24b   : > { %v3595_v51 = vpop.eup %3594 }
 0x24c   : > { %v698_v52 = vsel %vm667_vm3, %v3595_v51, 0.0 }
 0x24d   : > { %699 = vadd.xlane.f32.xlu0 %v698_v52 }
 0x24f   : > { %v3597_v53 = vpop.eup %3596 }
 0x250   : > { %v701_v54 = vsel %vm667_vm3, %v3597_v53, 0.0  ;;  %v3599_v55 = vpop.eup %3598 }
 0x251   : > { %702 = vadd.xlane.f32.xlu1 %v701_v54  ;;  %v695_v56 = vsel %vm667_vm3, %v3599_v55, 0.0 }
 0x255   : > { %696 = vadd.xlane.f32.xlu1 %v695_v56 }
 0x263   : > { %1016 = vrot.lane.b32.xlu0 %v3853_v15, %s3721_s12 }
 0x266   : > { %1094 = vrot.lane.b32.xlu1 %v3856_v16, %s3721_s12 }
 0x267   : > { %1242 = vrot.lane.b32.xlu0 %v3848_v14, %s3721_s12 }
 0x26a   : > { %1168 = vrot.lane.b32.xlu1 %v3870_v18, %s3721_s12  ;;  %s3660_s12 = sshll.u32 %s3730_s11, 4  ;;  %s3661_s12 = int_to_ptr.vmem [resolvable:$false] %s3660_s12 }
 0x2ce   : > { %v694_v58 = vpop.xlane.xlu0 %693 }
 0x2cf   : > { %3600 = vrcp.f32 %v694_v58 }
 0x2d6   : > { %v700_v61 = vpop.xlane.xlu0 %699 }
 0x2d7   : > { %3602 = vrcp.f32 %v700_v61 }
 0x2da   : > { %v703_v62 = vpop.xlane.xlu1 %702  ;;  %v1017_v5 = vpop.permute.xlu0 %1016 }
 0x2dc   : > { %v3601_v63 = vpop.eup %3600 }
 0x2dd   : > { %v705_v0 = vmul.f32 %v3601_v63, %v3593_v49 }
 0x2de   : > { %v697_v1 = vpop.xlane.xlu1 %696  ;;  %v1243_v13 = vpop.permute.xlu0 %1242 }
 0x2df   : > { %3604 = vrcp.f32 %v697_v1  ;;  %3392 = vmatmul.mubr.msk.f32.vlgmr.msra.gmra.mxu1 %vm367_vm2, %v705_v0 }
 0x2e0   : > { %3400 = vmatpush3.msra.mxu1 %v865_v59  ;;  %3401 = vmatprep.mubr.msk.f32.mxu1 %vm3719_vm1, %v3718_v8  ;;  %3606 = vrcp.f32 %v703_v62 }
 0x2e1   : > { %3409 = vmatprep.subr.mxu1 %v3718_v8 }
 0x2e2   : > { %v1095_v3 = vpop.permute.xlu1 %1094 }
 0x2e4   : > { %v3603_v2 = vpop.eup %3602 }
 0x2e5   : > { %v709_v4 = vmul.f32 %v3603_v2, %v3595_v51 }
 0x2e6   : > { %v1169_v6 = vpop.permute.xlu1 %1168 }
 0x2e7   : > { %3402 = vmatmul.mubr.msk.f32.vlgmr.msra.gmra.mxu1 %vm367_vm2, %v709_v4 }
 0x2e8   : > { %3410 = vmatpush3.xpose.msk.msra.mxu1 %vm367_vm2, %v1019_v57  ;;  %3411 = vmatprep.mubr.msk.f32.mxu1 %vm3719_vm1, %v3718_v8 }
 0x2e9   : > { %3419 = vmatprep.subr.mxu1 %v3718_v8 }
 0x2eb   : > { %3412 = vmatmul.mubr.msk.f32.vlgmr.msra.gmra.mxu1 %vm367_vm2, %v1017_v5 }
 0x2ec   : > { %v3605_v7 = vpop.eup %3604  ;;  %3420 = vmatpush3.xpose.msk.msra.mxu1 %vm367_vm2, %v1169_v6  ;;  %3421 = vmatprep.mubr.msk.f32.mxu1 %vm3719_vm1, %v3718_v8 }
 0x2ed   : > { %v707_v9 = vmul.f32 %v3605_v7, %v3599_v55  ;;  %3429 = vmatprep.subr.mxu1 %v3718_v8  ;;  %v3607_v10 = vpop.eup %3606 }
 0x2ee   : > { %v711_v11 = vmul.f32 %v3607_v10, %v3597_v53 }
 0x2ef   : > { %3397 = vmatmul.mubr.msk.f32.vlgmr.msra.gmra.mxu0 %vm367_vm2, %v707_v9  ;;  %3422 = vmatmul.mubr.msk.f32.vlgmr.msra.gmra.mxu1 %vm367_vm2, %v1017_v5 }
 0x2f0   : > { %3405 = vmatpush3.msra.mxu0 %v941_v60  ;;  %3406 = vmatprep.mubr.msk.f32.mxu0 %vm3719_vm1, %v3718_v8 }
 0x2f1   : > { %3414 = vmatprep.subr.mxu0 %v3718_v8  ;;  %3431 = vmatprep.mubr.msk.f32.mxu1 %vm3719_vm1, %v3718_v8 }
 0x2f3   : > { %3407 = vmatmul.mubr.msk.f32.vlgmr.msra.gmra.mxu0 %vm367_vm2, %v711_v11 }
 0x2f4   : > { %3415 = vmatpush3.xpose.msk.msra.mxu0 %vm367_vm2, %v1095_v3  ;;  %3416 = vmatprep.mubr.msk.f32.mxu0 %vm3719_vm1, %v3718_v8 }
 0x2f5   : > { %3424 = vmatprep.subr.mxu0 %v3718_v8 }
 0x2f7   : > { %3417 = vmatmul.mubr.msk.f32.vlgmr.msra.gmra.mxu0 %vm367_vm2, %v1017_v5 }
 0x2f8   : > { %3425 = vmatpush3.xpose.msk.msra.mxu0 %vm367_vm2, %v1243_v13  ;;  %3426 = vmatprep.mubr.msk.f32.mxu0 %vm3719_vm1, %v3718_v8 }
 0x2f9   : > { %3434 = vmatprep.subr.mxu0 %v3718_v8 }
 0x2fb   : > { %3427 = vmatmul.mubr.msk.f32.vlgmr.msra.gmra.mxu0 %vm367_vm2, %v1017_v5 }
 0x2fc   : > { %3436 = vmatprep.mubr.msk.f32.mxu0 %vm3719_vm1, %v3718_v8 }
 0x39f   : > { %v3943_v17 = vpop.f32.mrf.mxu1 }
 0x3a1   : > { %v3393_v19 = vpop.f32.mrf.mxu1 }
 0x3a7   : > { %v3945_v20 = vpop.f32.mrf.mxu1 }
 0x3a9   : > { %v3403_v21 = vpop.f32.mrf.mxu1 }
 0x3ab   : > { %v1090_v22 = vpop.f32.mrf.mxu1 }
 0x3ac   : > { %v1316_v23 = vmul.f32 0.35355338, %v1090_v22 }
 0x3ad   : > { %v3413_v24 = vpop.f32.mrf.mxu1 }
 0x3ae   : > { %v1320_v25 = vsel %vm667_vm3, %v1316_v23, -inf }
 0x3af   : > { %v3948_v26 = vpop.f32.mrf.mxu0  ;;  %1321 = vmax.xlane.f32.xlu1 %v1320_v25  ;;  %v1238_v27 = vpop.f32.mrf.mxu1 }
 0x3b0   : > { %v1318_v35 = vmul.f32 0.35355338, %v1238_v27 }
 0x3b1   : > { %v3398_v28 = vpop.f32.mrf.mxu0  ;;  %v3423_v29 = vpop.f32.mrf.mxu1 }
 0x3b2   : > { %v1326_v40 = vsel %vm667_vm3, %v1318_v35, -inf }
 0x3b3   : > { %v3950_v30 = vpop.f32.mrf.mxu0 }
 0x3b5   : > { %v3408_v31 = vpop.f32.mrf.mxu0 }
 0x3b7   : > { %v1164_v32 = vpop.f32.mrf.mxu0 }
 0x3b8   : > { %v1317_v33 = vmul.f32 0.35355338, %v1164_v32 }
 0x3b9   : > { %v3418_v34 = vpop.f32.mrf.mxu0 }
 0x3ba   : > { %v1323_v36 = vsel %vm667_vm3, %v1317_v33, -inf }
 0x3bb   : > { %1324 = vmax.xlane.f32.xlu0 %v1323_v36  ;;  %v1312_v37 = vpop.f32.mrf.mxu0 }
 0x3bc   : > { %v1319_v39 = vmul.f32 0.35355338, %v1312_v37 }
 0x3bd   : > { %v3428_v38 = vpop.f32.mrf.mxu0 }
 0x3be   : > { %v1329_v41 = vsel %vm667_vm3, %v1319_v39, -inf }
 0x3bf   : > { %1327 = vmax.xlane.f32.xlu0 %v1326_v40 }
 0x3c0   : > { %1364 = vrot.lane.b32.xlu1 %v3844_v12, %s3722_s13 }
 0x3c3   : > { %1330 = vmax.xlane.f32.xlu0 %v1329_v41 }
 0x3c4   : > { %1516 = vrot.lane.b32.xlu1 %v3870_v18, %s3722_s13 }
 0x3c8   : > { %1592 = vrot.lane.b32.xlu1 %v3848_v14, %s3722_s13 }
 0x3cc   : > { %1670 = vrot.lane.b32.xlu1 %v3844_v12, %s3723_s14 }
 0x3d9   : > { %1440 = vrot.lane.b32.xlu0 %v3856_v16, %s3722_s13  ;;  %s3729_s13 = smov 24  }
 0x438   : > { %v1322_v42 = vpop.xlane.xlu1 %1321 }
 0x439   : > { %v1332_v43 = vsub.f32 %v1316_v23, %v1322_v42 }
 0x43b   : > { %v1336_v44 = vmul.f32 1.442695, %v1332_v43 }
 0x43c   : > { %v1365_v45 = vpop.permute.xlu1 %1364 }
 0x43d   : > { %3608 = vpow2.f32 %v1336_v44  ;;  %3430 = vmatpush3.msra.mxu1 %v1365_v45 }
 0x43e   : > { %3439 = vmatprep.subr.mxu1 %v3718_v8 }
 0x440   : > { %v1517_v0 = vpop.permute.xlu1 %1516 }
 0x444   : > { %v1325_v46 = vpop.xlane.xlu0 %1324  ;;  %v1593_v1 = vpop.permute.xlu1 %1592 }
 0x445   : > { %v1333_v47 = vsub.f32 %v1317_v33, %v1325_v46 }
 0x447   : > { %v1338_v48 = vmul.f32 1.442695, %v1333_v47 }
 0x448   : > { %v1328_v49 = vpop.xlane.xlu0 %1327  ;;  %v1671_v2 = vpop.permute.xlu1 %1670 }
 0x449   : > { %3610 = vpow2.f32 %v1338_v48  ;;  %v1334_v50 = vsub.f32 %v1318_v35, %v1328_v49 }
 0x44a   : > { %v3609_v51 = vpop.eup %3608 }
 0x44b   : > { %v1340_v52 = vmul.f32 1.442695, %v1334_v50  ;;  %v1344_v53 = vsel %vm667_vm3, %v3609_v51, 0.0 }
 0x44c   : > { %1345 = vadd.xlane.f32.xlu1 %v1344_v53  ;;  %v1331_v54 = vpop.xlane.xlu0 %1330 }
 0x44d   : > { %3612 = vpow2.f32 %v1340_v52  ;;  %v1335_v55 = vsub.f32 %v1319_v39, %v1331_v54 }
 0x44f   : > { %v1342_v56 = vmul.f32 1.442695, %v1335_v55 }
 0x450   : > { %v1441_v57 = vpop.permute.xlu0 %1440 }
 0x451   : > { %3614 = vpow2.f32 %v1342_v56  ;;  %3435 = vmatpush3.msra.mxu0 %v1441_v57 }
 0x452   : > { %3444 = vmatprep.subr.mxu0 %v3718_v8 }
 0x456   : > { %v3611_v58 = vpop.eup %3610 }
 0x457   : > { %v1347_v59 = vsel %vm667_vm3, %v3611_v58, 0.0 }
 0x458   : > { %1348 = vadd.xlane.f32.xlu0 %v1347_v59 }
 0x45a   : > { %v3613_v60 = vpop.eup %3612 }
 0x45b   : > { %v1350_v61 = vsel %vm667_vm3, %v3613_v60, 0.0 }
 0x45c   : > { %1351 = vadd.xlane.f32.xlu1 %v1350_v61 }
 0x45e   : > { %v3615_v62 = vpop.eup %3614 }
 0x45f   : > { %v1353_v63 = vsel %vm667_vm3, %v3615_v62, 0.0 }
 0x460   : > { %1354 = vadd.xlane.f32.xlu0 %v1353_v63 }
 0x46d   : > { %1668 = vrot.lane.b32.xlu1 %v3853_v15, %s3723_s14 }
 0x471   : > { %1894 = vrot.lane.b32.xlu1 %v3848_v14, %s3723_s14 }
 0x476   : > { %1746 = vrot.lane.b32.xlu0 %v3856_v16, %s3723_s14 }
 0x47a   : > { %1820 = vrot.lane.b32.xlu0 %v3870_v18, %s3723_s14  ;;  %s243_s14 = sand.u32 1, %s3708_s22  }
 0x47b   : > { %s4165_s10 = scalar_lea.sflag [#allocation3], %s243_s14 }
 0x4d5   : > { %v1346_v3 = vpop.xlane.xlu1 %1345 }
 0x4d6   : > { %3616 = vrcp.f32 %v1346_v3 }
 0x4e1   : > { %v1349_v4 = vpop.xlane.xlu0 %1348 }
 0x4e2   : > { %3618 = vrcp.f32 %v1349_v4 }
 0x4e3   : > { %v3617_v5 = vpop.eup %3616 }
 0x4e4   : > { %v1357_v6 = vmul.f32 %v3617_v5, %v3609_v51 }
 0x4e5   : > { %v1352_v7 = vpop.xlane.xlu1 %1351 }
 0x4e6   : > { %3620 = vrcp.f32 %v1352_v7  ;;  %3432 = vmatmul.mubr.msk.f32.vlgmr.msra.gmra.mxu1 %vm367_vm2, %v1357_v6 }
 0x4e7   : > { %3440 = vmatpush3.msra.mxu1 %v1517_v0  ;;  %3441 = vmatprep.mubr.msk.f32.mxu1 %vm3719_vm1, %v3718_v8 }
 0x4e8   : > { %3449 = vmatprep.subr.mxu1 %v3718_v8 }
 0x4e9   : > { %v1355_v9 = vpop.xlane.xlu0 %1354  ;;  %v1669_v23 = vpop.permute.xlu1 %1668 }
 0x4ea   : > { %3622 = vrcp.f32 %v1355_v9 }
 0x4ed   : > { %v1747_v19 = vpop.permute.xlu0 %1746  ;;  %v1895_v27 = vpop.permute.xlu1 %1894 }
 0x4ef   : > { %v3619_v10 = vpop.eup %3618 }
 0x4f0   : > { %v1359_v11 = vmul.f32 %v3619_v10, %v3611_v58 }
 0x4f1   : > { %v1821_v25 = vpop.permute.xlu0 %1820 }
 0x4f2   : > { %3437 = vmatmul.mubr.msk.f32.vlgmr.msra.gmra.mxu0 %vm367_vm2, %v1359_v11 }
 0x4f3   : > { %v3621_v13 = vpop.eup %3620  ;;  %3445 = vmatpush3.msra.mxu0 %v1593_v1  ;;  %3446 = vmatprep.mubr.msk.f32.mxu0 %vm3719_vm1, %v3718_v8 }
 0x4f4   : > { %v1361_v21 = vmul.f32 %v3621_v13, %v3613_v60  ;;  %3454 = vmatprep.subr.mxu0 %v3718_v8 }
 0x4f6   : > { %3442 = vmatmul.mubr.msk.f32.vlgmr.msra.gmra.mxu1 %vm367_vm2, %v1361_v21 }
 0x4f7   : > { %v3623_v22 = vpop.eup %3622  ;;  %3450 = vmatpush3.xpose.msk.msra.mxu1 %vm367_vm2, %v1671_v2  ;;  %3451 = vmatprep.mubr.msk.f32.mxu1 %vm3719_vm1, %v3718_v8 }
 0x4f8   : > { %3459 = vmatprep.subr.mxu1 %v3718_v8  ;;  %v1363_v24 = vmul.f32 %v3623_v22, %v3615_v62 }
 0x4fa   : > { %3447 = vmatmul.mubr.msk.f32.vlgmr.msra.gmra.mxu0 %vm367_vm2, %v1363_v24  ;;  %3452 = vmatmul.mubr.msk.f32.vlgmr.msra.gmra.mxu1 %vm367_vm2, %v1669_v23 }
 0x4fb   : > { %3455 = vmatpush3.xpose.msk.msra.mxu0 %vm367_vm2, %v1747_v19  ;;  %3460 = vmatpush3.xpose.msk.msra.mxu1 %vm367_vm2, %v1821_v25 }
 0x4fc   : > { %3456 = vmatprep.mubr.msk.f32.mxu0 %vm3719_vm1, %v3718_v8  ;;  %3461 = vmatprep.mubr.msk.f32.mxu1 %vm3719_vm1, %v3718_v8 }
 0x4fd   : > { %3464 = vmatprep.subr.mxu0 %v3718_v8  ;;  %3469 = vmatprep.subr.mxu1 %v3718_v8 }
 0x4fe   : > { %3457 = vmatmul.mubr.msk.f32.vlgmr.msra.gmra.mxu0 %vm367_vm2, %v1669_v23  ;;  %3462 = vmatmul.mubr.msk.f32.vlgmr.msra.gmra.mxu1 %vm367_vm2, %v1669_v23 }
 0x4ff   : > { %3465 = vmatpush3.xpose.msk.msra.mxu0 %vm367_vm2, %v1895_v27  ;;  %3466 = vmatprep.mubr.msk.f32.mxu0 %vm3719_vm1, %v3718_v8 }
 0x500   : > { %3474 = vmatprep.subr.mxu0 %v3718_v8  ;;  %3471 = vmatprep.mubr.msk.f32.mxu1 %vm3719_vm1, %v3718_v8 }
 0x502   : > { %3467 = vmatmul.mubr.msk.f32.vlgmr.msra.gmra.mxu0 %vm367_vm2, %v1669_v23 }
 0x503   : > { %3476 = vmatprep.mubr.msk.f32.mxu0 %vm3719_vm1, %v3718_v8 }
 0x5a6   : > { %v4009_v28 = vpop.f32.mrf.mxu1 }
 0x5a8   : > { %v3433_v29 = vpop.f32.mrf.mxu1 }
 0x5b2   : > { %v4011_v31 = vpop.f32.mrf.mxu0 }
 0x5b4   : > { %v3438_v32 = vpop.f32.mrf.mxu0 }
 0x5b6   : > { %v4013_v33 = vpop.f32.mrf.mxu1 }
 0x5b8   : > { %v3443_v34 = vpop.f32.mrf.mxu1 }
 0x5ba   : > { %v4015_v35 = vpop.f32.mrf.mxu0  ;;  %v1742_v36 = vpop.f32.mrf.mxu1 }
 0x5bb   : > { %v1968_v37 = vmul.f32 0.35355338, %v1742_v36 }
 0x5bc   : > { %v3448_v38 = vpop.f32.mrf.mxu0  ;;  %v3453_v39 = vpop.f32.mrf.mxu1 }
 0x5bd   : > { %v1972_v40 = vsel %vm667_vm3, %v1968_v37, -inf }
 0x5be   : > { %v1816_v41 = vpop.f32.mrf.mxu0  ;;  %1973 = vmax.xlane.f32.xlu0 %v1972_v40  ;;  %v1890_v42 = vpop.f32.mrf.mxu1 }
 0x5bf   : > { %v1969_v43 = vmul.f32 0.35355338, %v1816_v41  ;;  %v1970_v44 = vmul.f32 0.35355338, %v1890_v42 }
 0x5c0   : > { %v3458_v45 = vpop.f32.mrf.mxu0  ;;  %v3463_v46 = vpop.f32.mrf.mxu1 }
 0x5c1   : > { %v1975_v47 = vsel %vm667_vm3, %v1969_v43, -inf  ;;  %v1978_v48 = vsel %vm667_vm3, %v1970_v44, -inf }
 0x5c2   : > { %1976 = vmax.xlane.f32.xlu1 %v1975_v47  ;;  %v1964_v49 = vpop.f32.mrf.mxu0  ;;  %1979 = vmax.xlane.f32.xlu0 %v1978_v48 }
 0x5c3   : > { %v1971_v50 = vmul.f32 0.35355338, %v1964_v49 }
 0x5c4   : > { %v3468_v51 = vpop.f32.mrf.mxu0 }
 0x5c5   : > { %v1981_v52 = vsel %vm667_vm3, %v1971_v50, -inf }
 0x5c6   : > { %1982 = vmax.xlane.f32.xlu0 %v1981_v52 }
 0x5d3   : > { %2092 = vrot.lane.b32.xlu1 %v3856_v16, %s3724_s15 }
 0x5d7   : > { %2168 = vrot.lane.b32.xlu1 %v3870_v18, %s3724_s15 }
 0x5db   : > { %2244 = vrot.lane.b32.xlu1 %v3848_v14, %s3724_s15 }
 0x5dc   : > { %2016 = vrot.lane.b32.xlu0 %v3844_v12, %s3724_s15  ;;  %s3212_s15 = sshll.u32 %s243_s14, 4 }
 0x5df   : > { %2398 = vrot.lane.b32.xlu1 %v3856_v16, %s3725_s16 }
 0x5e0   : > { %2322 = vrot.lane.b32.xlu0 %v3844_v12, %s3725_s16 }
 0x647   : > { %v1974_v53 = vpop.xlane.xlu0 %1973 }
 0x648   : > { %v1984_v54 = vsub.f32 %v1968_v37, %v1974_v53 }
 0x64a   : > { %v1988_v55 = vmul.f32 1.442695, %v1984_v54 }
 0x64b   : > { %v1977_v56 = vpop.xlane.xlu1 %1976  ;;  %v1980_v57 = vpop.xlane.xlu0 %1979 }
 0x64c   : > { %3624 = vpow2.f32 %v1988_v55  ;;  %v1985_v58 = vsub.f32 %v1969_v43, %v1977_v56  ;;  %v1986_v59 = vsub.f32 %v1970_v44, %v1980_v57 }
 0x64e   : > { %v1990_v60 = vmul.f32 1.442695, %v1985_v58  ;;  %v1992_v61 = vmul.f32 1.442695, %v1986_v59 }
 0x64f   : > { %v2093_v62 = vpop.permute.xlu1 %2092  ;;  %v1983_v63 = vpop.xlane.xlu0 %1982 }
 0x650   : > { %3626 = vpow2.f32 %v1990_v60  ;;  %v1987_v0 = vsub.f32 %v1971_v50, %v1983_v63  ;;  %3475 = vmatpush3.msra.mxu0 %v2093_v62 }
 0x651   : > { %3628 = vpow2.f32 %v1992_v61  ;;  %3484 = vmatprep.subr.mxu0 %v3718_v8 }
 0x652   : > { %v1994_v1 = vmul.f32 1.442695, %v1987_v0 }
 0x653   : > { %v2017_v2 = vpop.permute.xlu0 %2016  ;;  %v2169_v13 = vpop.permute.xlu1 %2168 }
 0x654   : > { %3630 = vpow2.f32 %v1994_v1  ;;  %3470 = vmatpush3.msra.mxu1 %v2017_v2 }
 0x655   : > { %3479 = vmatprep.subr.mxu1 %v3718_v8 }
 0x657   : > { %v2245_v19 = vpop.permute.xlu1 %2244  ;;  %v2323_v21 = vpop.permute.xlu0 %2322 }
 0x659   : > { %v3625_v3 = vpop.eup %3624 }
 0x65a   : > { %v1996_v4 = vsel %vm667_vm3, %v3625_v3, 0.0 }
 0x65b   : > { %1997 = vadd.xlane.f32.xlu0 %v1996_v4  ;;  %v2399_v22 = vpop.permute.xlu1 %2398 }
 0x65d   : > { %v3627_v5 = vpop.eup %3626 }
 0x65e   : > { %v3629_v6 = vpop.eup %3628  ;;  %v1999_v7 = vsel %vm667_vm3, %v3627_v5, 0.0 }
 0x65f   : > { %2000 = vadd.xlane.f32.xlu1 %v1999_v7  ;;  %v2002_v9 = vsel %vm667_vm3, %v3629_v6, 0.0 }
 0x660   : > { %2003 = vadd.xlane.f32.xlu0 %v2002_v9 }
 0x661   : > { %v3631_v10 = vpop.eup %3630 }
 0x662   : > { %v2005_v11 = vsel %vm667_vm3, %v3631_v10, 0.0 }
 0x663   : > { %2006 = vadd.xlane.f32.xlu1 %v2005_v11 }
 0x674   : > { %2472 = vrot.lane.b32.xlu1 %v3870_v18, %s3725_s16 }
 0x676   : > { %2320 = vrot.lane.b32.xlu0 %v3853_v15, %s3725_s16 }
 0x67a   : > { %2546 = vrot.lane.b32.xlu0 %v3848_v14, %s3725_s16 }
 0x6e4   : > { %v1998_v23 = vpop.xlane.xlu0 %1997 }
 0x6e5   : > { %3632 = vrcp.f32 %v1998_v23 }
 0x6e8   : > { %v2001_v24 = vpop.xlane.xlu1 %2000 }
 0x6e9   : > { %3634 = vrcp.f32 %v2001_v24  ;;  %v2004_v25 = vpop.xlane.xlu0 %2003 }
 0x6ea   : > { %3636 = vrcp.f32 %v2004_v25 }
 0x6ec   : > { %v2007_v27 = vpop.xlane.xlu1 %2006 }
 0x6ed   : > { %3638 = vrcp.f32 %v2007_v27  ;;  %v2321_v39 = vpop.permute.xlu0 %2320 }
 0x6f0   : > { %v2473_v41 = vpop.permute.xlu1 %2472 }
 0x6f1   : > { %v2547_v42 = vpop.permute.xlu0 %2546 }
 0x6f2   : > { %v3633_v29 = vpop.eup %3632 }
 0x6f3   : > { %v2009_v32 = vmul.f32 %v3633_v29, %v3625_v3 }
 0x6f5   : > { %3472 = vmatmul.mubr.msk.f32.vlgmr.msra.gmra.mxu1 %vm367_vm2, %v2009_v32 }
 0x6f6   : > { %v3635_v15 = vpop.eup %3634  ;;  %3480 = vmatpush3.msra.mxu1 %v2169_v13  ;;  %3481 = vmatprep.mubr.msk.f32.mxu1 %vm3719_vm1, %v3718_v8 }
 0x6f7   : > { %v3637_v34 = vpop.eup %3636  ;;  %3489 = vmatprep.subr.mxu1 %v3718_v8  ;;  %v2011_v36 = vmul.f32 %v3635_v15, %v3627_v5 }
 0x6f8   : > { %v2013_v37 = vmul.f32 %v3637_v34, %v3629_v6 }
 0x6f9   : > { %3477 = vmatmul.mubr.msk.f32.vlgmr.msra.gmra.mxu0 %vm367_vm2, %v2011_v36 }
 0x6fa   : > { %v3639_v38 = vpop.eup %3638  ;;  %3482 = vmatmul.mubr.msk.f32.vlgmr.msra.gmra.mxu1 %vm367_vm2, %v2013_v37  ;;  %3485 = vmatpush3.msra.mxu0 %v2245_v19 }
 0x6fb   : > { %3490 = vmatpush3.xpose.msk.msra.mxu1 %vm367_vm2, %v2323_v21  ;;  %3486 = vmatprep.mubr.msk.f32.mxu0 %vm3719_vm1, %v3718_v8  ;;  %v2015_v40 = vmul.f32 %v3639_v38, %v3631_v10 }
 0x6fc   : > { %3491 = vmatprep.mubr.msk.f32.mxu1 %vm3719_vm1, %v3718_v8  ;;  %3494 = vmatprep.subr.mxu0 %v3718_v8 }
 0x6fd   : > { %3499 = vmatprep.subr.mxu1 %v3718_v8  ;;  %3487 = vmatmul.mubr.msk.f32.vlgmr.msra.gmra.mxu0 %vm367_vm2, %v2015_v40 }
 0x6fe   : > { %3492 = vmatmul.mubr.msk.f32.vlgmr.msra.gmra.mxu1 %vm367_vm2, %v2321_v39  ;;  %3495 = vmatpush3.xpose.msk.msra.mxu0 %vm367_vm2, %v2399_v22 }
 0x6ff   : > { %3500 = vmatpush3.xpose.msk.msra.mxu1 %vm367_vm2, %v2473_v41  ;;  %3496 = vmatprep.mubr.msk.f32.mxu0 %vm3719_vm1, %v3718_v8 }
 0x700   : > { %3501 = vmatprep.mubr.msk.f32.mxu1 %vm3719_vm1, %v3718_v8  ;;  %3504 = vmatprep.subr.mxu0 %v3718_v8 }
 0x701   : > { %3497 = vmatmul.mubr.msk.f32.vlgmr.msra.gmra.mxu0 %vm367_vm2, %v2321_v39  ;;  %3509 = vmatprep.subr.mxu1 %v3718_v8 }
 0x702   : > { %3502 = vmatmul.mubr.msk.f32.vlgmr.msra.gmra.mxu1 %vm367_vm2, %v2321_v39  ;;  %3505 = vmatpush3.xpose.msk.msra.mxu0 %vm367_vm2, %v2547_v42 }
 0x703   : > { %3506 = vmatprep.mubr.msk.f32.mxu0 %vm3719_vm1, %v3718_v8  ;;  %3511 = vmatprep.mubr.msk.f32.mxu1 %vm3719_vm1, %v3718_v8 }
 0x704   : > { %3514 = vmatprep.subr.mxu0 %v3718_v8 }
 0x705   : > { %3507 = vmatmul.mubr.msk.f32.vlgmr.msra.gmra.mxu0 %vm367_vm2, %v2321_v39 }
 0x706   : > { %3516 = vmatprep.mubr.msk.f32.mxu0 %vm3719_vm1, %v3718_v8 }
 0x7b5   : > { %v4075_v43 = vpop.f32.mrf.mxu1 }
 0x7b7   : > { %v3473_v44 = vpop.f32.mrf.mxu1 }
 0x7b8   : > { %v3037_v44 = vld [vmem:[%s4210_s4 + $0x18] sm:$0xff] }
 0x7b9   : > { %v4077_v45 = vpop.f32.mrf.mxu0 }
 0x7ba   : > { %v4079_v46 = vpop.f32.mrf.mxu1 }
 0x7bb   : > { %v3478_v47 = vpop.f32.mrf.mxu0 }
 0x7bc   : > { %v3483_v48 = vpop.f32.mrf.mxu1  ;;  %v3034_v47 = vld [vmem:[%s4210_s4] sm:$0xff] }
 0x7bd   : > { %v4081_v49 = vpop.f32.mrf.mxu0 }
 0x7be   : > { %v2394_v50 = vpop.f32.mrf.mxu1 }
 0x7bf   : > { %v2620_v51 = vmul.f32 0.35355338, %v2394_v50  ;;  %v3488_v52 = vpop.f32.mrf.mxu0 }
 0x7c0   : > { %v3493_v53 = vpop.f32.mrf.mxu1 }
 0x7c1   : > { %v2468_v54 = vpop.f32.mrf.mxu0  ;;  %v2624_v55 = vsel %vm667_vm3, %v2620_v51, -inf }
 0x7c2   : > { %v2621_v56 = vmul.f32 0.35355338, %v2468_v54  ;;  %2625 = vmax.xlane.f32.xlu1 %v2624_v55  ;;  %v2542_v57 = vpop.f32.mrf.mxu1 }
 0x7c3   : > { %v3498_v58 = vpop.f32.mrf.mxu0  ;;  %v2622_v59 = vmul.f32 0.35355338, %v2542_v57 }
 0x7c4   : > { %v3503_v60 = vpop.f32.mrf.mxu1  ;;  %v2627_v61 = vsel %vm667_vm3, %v2621_v56, -inf }
 0x7c5   : > { %2628 = vmax.xlane.f32.xlu0 %v2627_v61  ;;  %v2616_v62 = vpop.f32.mrf.mxu0  ;;  %v2630_v1 = vsel %vm667_vm3, %v2622_v59, -inf }
 0x7c6   : > { %v2623_v0 = vmul.f32 0.35355338, %v2616_v62 }
 0x7c7   : > { %v3508_v63 = vpop.f32.mrf.mxu0 }
 0x7c8   : > { %v2633_v2 = vsel %vm667_vm3, %v2623_v0, -inf }
 0x7c9   : > { %2631 = vmax.xlane.f32.xlu0 %v2630_v1 }
 0x7cd   : > { %2634 = vmax.xlane.f32.xlu0 %v2633_v2 }
 0x7d3   : > { %2668 = vrot.lane.b32.xlu1 %v3844_v12, %s3726_s17 }
 0x84b   : > { %v2626_v3 = vpop.xlane.xlu1 %2625 }
 0x84c   : > { %v2636_v4 = vsub.f32 %v2620_v51, %v2626_v3 }
 0x84e   : > { %v2640_v5 = vmul.f32 1.442695, %v2636_v4  ;;  %v2629_v6 = vpop.xlane.xlu0 %2628 }
 0x84f   : > { %v2637_v7 = vsub.f32 %v2621_v56, %v2629_v6  ;;  %v2669_v9 = vpop.permute.xlu1 %2668 }
 0x850   : > { %3640 = vpow2.f32 %v2640_v5  ;;  %3510 = vmatpush3.msra.mxu1 %v2669_v9 }
 0x851   : > { %v2642_v10 = vmul.f32 1.442695, %v2637_v7  ;;  %3519 = vmatprep.subr.mxu1 %v3718_v8 }
 0x852   : > { %v2632_v11 = vpop.xlane.xlu0 %2631 }
 0x853   : > { %3642 = vpow2.f32 %v2642_v10  ;;  %v2638_v13 = vsub.f32 %v2622_v59, %v2632_v11 }
 0x855   : > { %v2644_v19 = vmul.f32 1.442695, %v2638_v13 }
 0x856   : > { %v2635_v21 = vpop.xlane.xlu0 %2634 }
 0x857   : > { %3644 = vpow2.f32 %v2644_v19  ;;  %v2639_v22 = vsub.f32 %v2623_v0, %v2635_v21 }
 0x859   : > { %v2646_v23 = vmul.f32 1.442695, %v2639_v22 }
 0x85b   : > { %3646 = vpow2.f32 %v2646_v23 }
 0x85d   : > { %v3641_v12 = vpop.eup %3640 }
 0x85e   : > { %v2648_v24 = vsel %vm667_vm3, %v3641_v12, 0.0 }
 0x85f   : > { %2649 = vadd.xlane.f32.xlu1 %v2648_v24 }
 0x860   : > { %v3643_v25 = vpop.eup %3642 }
 0x861   : > { %v2651_v27 = vsel %vm667_vm3, %v3643_v25, 0.0 }
 0x862   : > { %2652 = vadd.xlane.f32.xlu0 %v2651_v27 }
 0x864   : > { %v3645_v29 = vpop.eup %3644 }
 0x865   : > { %v2654_v32 = vsel %vm667_vm3, %v3645_v29, 0.0 }
 0x866   : > { %2655 = vadd.xlane.f32.xlu1 %v2654_v32 }
 0x868   : > { %v3647_v15 = vpop.eup %3646 }
 0x869   : > { %v2657_v34 = vsel %vm667_vm3, %v3647_v15, 0.0 }
 0x86a   : > { %2658 = vadd.xlane.f32.xlu0 %v2657_v34 }
 0x877   : > { %2820 = vrot.lane.b32.xlu1 %v3870_v18, %s3726_s17 }
 0x87b   : > { %2896 = vrot.lane.b32.xlu1 %v3848_v14, %s3726_s17 }
 0x87f   : > { %2976 = vrot.lane.b32.xlu1 %v4009_v28, %s3727_s18 }
 0x880   : > { %2744 = vrot.lane.b32.xlu0 %v3856_v16, %s3726_s17 }
 0x883   : > { %2980 = vrot.lane.b32.xlu1 %v4013_v33, %s3727_s18 }
 0x884   : > { %2978 = vrot.lane.b32.xlu0 %v4011_v31, %s3727_s18 }
 0x887   : > { %2992 = vrot.lane.b32.xlu1 %v4075_v43, %s3728_s19 }
 0x888   : > { %2982 = vrot.lane.b32.xlu0 %v4015_v35, %s3727_s18 }
 0x88b   : > { %2996 = vrot.lane.b32.xlu1 %v4079_v46, %s3728_s19 }
 0x88c   : > { %2994 = vrot.lane.b32.xlu0 %v4077_v45, %s3728_s19  ;;  %v3036_v45 = vld [vmem:[%s4210_s4 + $0x10] sm:$0xff] }
 0x890   : > { %2998 = vrot.lane.b32.xlu0 %v4081_v49, %s3728_s19  ;;  %s245_s19 = scalar_lea.vmem [#allocation2], %s3212_s15 }
 0x891   : > { %s3146_s20 = sshll.u32 %s245_s19, 4  ;;  %s4156_s20 = int_to_ptr.vmem [resolvable:$true] %s3146_s20 }
 0x892   : > { %s3656_s25 = scalar_lea.vmem %s4156_s20, 256  ;;  %p3663_p0 = scmp.lt.s32.totalorder %s4156_s20, %s3661_s12 }
 0x893   : > { %p3657_p11 = scmp.ne.s32.totalorder %s4156_s20, %s3656_s25 }
 0x895   : > { %p3658_p12 = pnand %p3657_p11, %p3805_p5 }
 0x897   : > { %p3659_p13 = pneg %p3658_p12 }
 0x8e8   : > { %v2650_v14 = vpop.xlane.xlu1 %2649 }
 0x8e9   : > { %3648 = vrcp.f32 %v2650_v14 }
 0x8eb   : > { %v2653_v16 = vpop.xlane.xlu0 %2652 }
 0x8ec   : > { %3650 = vrcp.f32 %v2653_v16 }
 0x8ef   : > { %v2656_v18 = vpop.xlane.xlu1 %2655 }
 0x8f0   : > { %3652 = vrcp.f32 %v2656_v18 }
 0x8f3   : > { %v2659_v28 = vpop.xlane.xlu0 %2658  ;;  %v2821_v33 = vpop.permute.xlu1 %2820 }
 0x8f4   : > { %3654 = vrcp.f32 %v2659_v28 }
 0x8f6   : > { %v3649_v31 = vpop.eup %3648 }
 0x8f7   : > { %v2745_v36 = vpop.permute.xlu0 %2744  ;;  %v2661_v37 = vmul.f32 %v3649_v31, %v3641_v12  ;;  %v2897_v39 = vpop.permute.xlu1 %2896 }
 0x8f8   : > { %3515 = vmatpush3.msra.mxu0 %v2745_v36 }
 0x8f9   : > { %v3651_v35 = vpop.eup %3650  ;;  %3512 = vmatmul.mubr.msk.f32.vlgmr.msra.gmra.mxu1 %vm367_vm2, %v2661_v37  ;;  %3524 = vmatprep.subr.mxu0 %v3718_v8 }
 0x8fa   : > { %3520 = vmatpush3.msra.mxu1 %v2821_v33  ;;  %v2663_v38 = vmul.f32 %v3651_v35, %v3643_v25  ;;  %3521 = vmatprep.mubr.msk.f32.mxu1 %vm3719_vm1, %v3718_v8 }
 0x8fb   : > { %3529 = vmatprep.subr.mxu1 %v3037_v44  ;;  %v2977_v55 = vpop.permute.xlu1 %2976  ;;  %v2979_v56 = vpop.permute.xlu0 %2978 }
 0x8fc   : > { %3517 = vmatmul.mubr.msk.f32.vlgmr.msra.gmra.mxu0 %vm367_vm2, %v2663_v38  ;;  %v3020_v0 = vsel %vm367_vm2, %v3943_v17, %v2977_v55  ;;  %v3021_v1 = vsel %vm367_vm2, %v3948_v26, %v2979_v56 }
 0x8fd   : > { %v3653_v40 = vpop.eup %3652  ;;  %3525 = vmatpush3.msra.mxu0 %v2897_v39  ;;  %3526 = vmatprep.mubr.msk.f32.mxu0 %vm3719_vm1, %v3718_v8  ;;  %v3035_v8 = vld [vmem:[%s4210_s4 + $0x8] sm:$0xff] }
 0x8fe   : > { %v2665_v41 = vmul.f32 %v3653_v40, %v3645_v29 }
 0x8ff   : > { %v2981_v57 = vpop.permute.xlu1 %2980  ;;  %v2983_v58 = vpop.permute.xlu0 %2982 }
 0x900   : > { %3522 = vmatmul.mubr.msk.f32.vlgmr.msra.gmra.mxu1 %vm367_vm2, %v2665_v41  ;;  %v3022_v17 = vsel %vm367_vm2, %v3945_v20, %v2981_v57  ;;  %v3023_v26 = vsel %vm367_vm2, %v3950_v30, %v2983_v58  ;;  %v3268_v20 = vld [vmem:[%s4211_s5] ss:$0 sm:$0xff] }
 0x901   : > { %v3655_v42 = vpop.eup %3654  ;;  %3530 = vmatpush3.msra.mxu1 %v3037_v44 }
 0x902   : > { %v2667_v43 = vmul.f32 %v3655_v42, %v3647_v15  ;;  %3531 = vmatprep.subr.mxu1 %v3036_v45 }
 0x903   : > { %3532 = vmatpush3.msra.mxu1 %v3036_v45  ;;  %v2993_v59 = vpop.permute.xlu1 %2992  ;;  %v2995_v60 = vpop.permute.xlu0 %2994 }
 0x904   : > { %3527 = vmatmul.mubr.msk.f32.vlgmr.msra.gmra.mxu0 %vm367_vm2, %v2667_v43  ;;  %3533 = vmatprep.subr.mxu1 %v3035_v8  ;;  %v3025_v2 = vsel %vm3024_vm4, %v3020_v0, %v2993_v59  ;;  %v3026_v3 = vsel %vm3024_vm4, %v3021_v1, %v2995_v60 }
 0x905   : > { %3534 = vmatpush3.msra.mxu1 %v3035_v8 }
 0x906   : > { %3535 = vmatprep.subr.mxu1 %v3034_v47 }
 0x907   : > { %3536 = vmatpush3.msra.mxu1 %v3034_v47  ;;  %v2997_v61 = vpop.permute.xlu1 %2996  ;;  %v2999_v62 = vpop.permute.xlu0 %2998 }
 0x908   : > { %v3027_v10 = vsel %vm3024_vm4, %v3022_v17, %v2997_v61  ;;  %v3028_v11 = vsel %vm3024_vm4, %v3023_v26, %v2999_v62 }
 0x9b9   : > { %v2740_v46 = vpop.f32.mrf.mxu1 }
 0x9ba   : > { %3008 = vrot.lane.b32.xlu1 %v2740_v46, %s3729_s13 }
 0x9bb   : > { %v3513_v48 = vpop.f32.mrf.mxu1 }
 0x9bc   : > { %v2816_v49 = vpop.f32.mrf.mxu0 }
 0x9bd   : > { %3010 = vrot.lane.b32.xlu0 %v2816_v49, %s3729_s13 }
 0x9be   : > { %v3518_v50 = vpop.f32.mrf.mxu0 }
 0x9c0   : > { %v2892_v51 = vpop.f32.mrf.mxu1 }
 0x9c1   : > { %3012 = vrot.lane.b32.xlu1 %v2892_v51, %s3729_s13 }
 0x9c2   : > { %v3523_v52 = vpop.f32.mrf.mxu1 }
 0x9c4   : > { %v2968_v53 = vpop.f32.mrf.mxu0 }
 0x9c5   : > { %3014 = vrot.lane.b32.xlu0 %v2968_v53, %s3729_s13  ;;  %s3662_s13 = scalar_lea.vmem %s3661_s12, 512 }
 0x9c6   : > { %v3528_v54 = vpop.f32.mrf.mxu0  ;;  %p3664_p1 = scmp.lt.s32.totalorder %s3662_s13, %s3656_s25 }
 0x9c8   : > { %p3665_p2 = por %p3664_p1, %p3663_p0 }
 0x9ca   : > { %p3666_p3 = pnand %p3665_p2, %p3659_p13 }
 0xa2c   : > { %v3009_v63 = vpop.permute.xlu1 %3008 }
 0xa2d   : > { %v3030_v5 = vsel %vm3029_vm5, %v3025_v2, %v3009_v63 }
 0xa2f   : > { %v3011_v4 = vpop.permute.xlu0 %3010 }
 0xa30   : > { %v3031_v6 = vsel %vm3029_vm5, %v3026_v3, %v3011_v4 }
 0xa31   : > { %v3049_v7 = vcombine.low %v3030_v5, %v3031_v6 }
 0xa33   : > { %3537 = vmatprep.mubr.msk.f32.mxu1 %vm268_vm0, %v3049_v7  ;;  %v3013_v9 = vpop.permute.xlu1 %3012 }
 0xa34   : > { %v3032_v19 = vsel %vm3029_vm5, %v3027_v10, %v3013_v9 }
 0xa37   : > { %v3015_v13 = vpop.permute.xlu0 %3014 }
 0xa38   : > { %v3033_v21 = vsel %vm3029_vm5, %v3028_v11, %v3015_v13 }
 0xa39   : > { %v3050_v22 = vcombine.low %v3032_v19, %v3033_v21 }
 0xa3b   : > { %3538 = vmatmul.mubr.msk.f32.vlgmr.msra.gmra.mxu1 %vm268_vm0, %v3050_v22 }
 0xafb   : > { %v3539_v30 = vpop.f32.mrf.mxu1 }
 0xafc   : > { %v3127_v23 = vadd.f32 %v3539_v30, %v3268_v20 }
 0xafd   : > { %v3121_v12 = vpop.f32.mrf.mxu1 }
 0xafe   : > { %3131 = vst.msk [vmem:[%s245_s19 + $0x8] sm:$0xff] %vm268_vm0, %v3127_v23  ;;  %v3122_v24 = vadd.f32 %v3268_v20, %v3121_v12 }
 0xb00   : > { %3130 = vst.msk [vmem:[%s245_s19] sm:$0xff] %vm268_vm0, %v3122_v24 }
 0xb01   : > { %3669 = shalt.err (!%p3666_p3)
}
 0xb02   : > { %s3670_s14 = scalar_lea.hbm %s4162_s9, 256  ;;  %s3674_s17 = scalar_lea.hbm %s4212_s6, 512 }
 0xb03   : > { %p3671_p4 = scmp.ne.s32.totalorder %s4162_s9, %s3670_s14  ;;  %p3675_p9 = scmp.lt.s32.totalorder %s4162_s9, %s4212_s6 }
 0xb04   : > { %p3676_p10 = scmp.lt.s32.totalorder %s3674_s17, %s3670_s14 }
 0xb05   : > { %p3672_p7 = pnand %p3671_p4, %p3805_p5 }
 0xb06   : > { %p3677_p11 = por %p3676_p10, %p3675_p9 }
 0xb07   : > { %p3673_p8 = pneg %p3672_p7 }
 0xb09   : > { %p3678_p12 = pnand %p3677_p11, %p3673_p8 }
 0xb0b   : > { %3681 = shalt.err (!%p3678_p12)
}
 0xb0c   : > { %s3731_s28 = smov 128  }
 0xb0d   : > { %3540 = dma.vmem_to_hbm [thread:$0]  (%p3805_p5), %s4156_s20, 256, %s4162_s9, %s4165_s10, %s3731_s28, %s3731_s28, %s3727_s18  }
 0xb0e PF: > { %p3546_p13 = scmp.ge.s32.totalorder %s3716_s24, 2  ;;  %s3161_s29 = sand.u32 1, %s3704_s21  }
 0xb0f   : > { %s3162_s25 = scalar_lea.sflag [#allocation3], %s3161_s29 }
 0xb10   : > { %p3543_p0 = pnand %p3546_p13, %p3809_p6 }
 0xb12   : > { %p3544_p1 = pneg %p3543_p0 }
 0xb14   : > { %3699 = dma.done.wait (%p3544_p1), %s3162_s25, 256  }
 0xb15   : > { %3701 = vsyncadd (%p3544_p1), %s3162_s25, 4294967040  ;;  %p16_p2 = scmp.ge.s32.totalorder %s3792_s27, 4   ;;  %s4215_s21 = smov %s3708_s22 }
 0xb16   : > { %s4216_s22 = smov %s3712_s23  ;;  %s4217_s23 = smov %s3803_s30 }
 0xb17   : > { %s4218_s24 = smov %s3792_s27  ;;  %18 = sbr.rel (!%p16_p2) target bundleno = 3 (0x3), region = 79 }
 0xb1c   :  { %3167 = vsyncpa [#allocation3], 1 }
 0xb1d   :  { %3169 = vsyncpa [#allocation3 + $0x1], 1 }

</bundles_post_ra>
